<compile_context>
chip_gen: v7x
topology: tpu7x:2x2x1
jax: 0.10.0
libtpu: 0.0.40
codegen_flags: <defaults>
</compile_context>

<pallas_src>
import functools

import jax
import jax.numpy as jnp
from jax import lax
from jax.experimental import pallas as pl
from jax.experimental.pallas import tpu as pltpu

LN_EPS = 1e-5


def _round_up(x, m):
    return (x + m - 1) // m * m


def _pick_tile(M, tile_m=512, min_tiles=2, align=16):
    """Balanced M tiles: >=2 grid steps (megacore/pipelining), 16-row aligned (bf16)."""
    n = max(-(-M // tile_m), min_tiles)
    tm = max(align, _round_up(-(-M // n), align))
    Mp = _round_up(M, tm)
    return tm, Mp, Mp // tm


# ----------------------------------------------------------------------------
# Pallas kernels
# ----------------------------------------------------------------------------
def _proj_bias_ln_kernel(p_ref, w_ref, b_ref, g_ref, beta_ref, o_ref):
    # p_ref: [TM, K] bf16, w_ref: [K, C] bf16, b/g/beta: [1, C] f32, o_ref: [TM, C] bf16
    y = jnp.dot(p_ref[...], w_ref[...], preferred_element_type=jnp.float32)
    y = y + b_ref[...]
    mu = jnp.mean(y, axis=-1, keepdims=True)
    d = y - mu
    var = jnp.mean(d * d, axis=-1, keepdims=True)
    out = d * lax.rsqrt(var + LN_EPS) * g_ref[...] + beta_ref[...]
    o_ref[...] = out.astype(o_ref.dtype)


def _proj_bias_kernel(p_ref, w_ref, b_ref, o_ref):
    y = jnp.dot(p_ref[...], w_ref[...], preferred_element_type=jnp.float32)
    o_ref[...] = (y + b_ref[...]).astype(o_ref.dtype)


def _ln_patch_proj_kernel(x_ref, w_ref, b_ref, g_ref, beta_ref, o_ref, *, in_chans):
    # Fused pre-LN(in_chans) + 2x2 patch projection (non-overlapped patch_size==2 path).
    # x_ref: [TM, 4*C] bf16 token-major (each row = 4 pixels in (ki,kj) order, C chans each)
    # w_ref: [4*C, Cout] bf16, b_ref: [1, Cout] f32, g/beta: [1, C] f32, o_ref: [TM, Cout] bf16
    C = in_chans
    x = x_ref[...]
    g = g_ref[...]
    bt = beta_ref[...]
    chunks = []
    for j in range(4):  # static unroll; slices are lane-aligned (C % 128 == 0)
        c = x[:, j * C:(j + 1) * C].astype(jnp.float32)
        mu = jnp.mean(c, axis=-1, keepdims=True)
        d = c - mu
        var = jnp.mean(d * d, axis=-1, keepdims=True)
        chunks.append((d * lax.rsqrt(var + LN_EPS) * g + bt).astype(jnp.bfloat16))
    xn = jnp.concatenate(chunks, axis=-1)                    # [TM, 4*C] bf16
    y = jnp.dot(xn, w_ref[...], preferred_element_type=jnp.float32) + b_ref[...]
    o_ref[...] = y.astype(o_ref.dtype)


def _ln_kernel(x_ref, g_ref, b_ref, o_ref):
    x = x_ref[...].astype(jnp.float32)
    mu = jnp.mean(x, axis=-1, keepdims=True)
    d = x - mu
    var = jnp.mean(d * d, axis=-1, keepdims=True)
    o_ref[...] = (d * lax.rsqrt(var + LN_EPS) * g_ref[...] + b_ref[...]).astype(o_ref.dtype)


# ----------------------------------------------------------------------------
# Pallas wrappers (row-tiled, "parallel" grid for megacore)
# ----------------------------------------------------------------------------
def fused_patch_proj(patches, w, b, gamma, beta, *, apply_ln, tile_m=512,
                     out_dtype=jnp.bfloat16):
    """(im2col patches) @ W + bias, optionally fused with LayerNorm(embed_dim)."""
    M, K = patches.shape
    Cout = w.shape[1]
    tm, Mp, grid = _pick_tile(M, tile_m)
    if Mp != M:
        patches = jnp.pad(patches, ((0, Mp - M), (0, 0)))

    p_bf16 = patches.astype(jnp.bfloat16)
    w_bf16 = w.astype(jnp.bfloat16)
    b2 = b.reshape(1, Cout).astype(jnp.float32)

    row_spec = pl.BlockSpec((tm, K), lambda i: (i, 0))
    w_spec = pl.BlockSpec((K, Cout), lambda i: (0, 0))
    vec_spec = pl.BlockSpec((1, Cout), lambda i: (0, 0))
    out_spec = pl.BlockSpec((tm, Cout), lambda i: (i, 0))
    cparams = pltpu.CompilerParams(dimension_semantics=("parallel",))
    cost = pl.CostEstimate(
        flops=2 * Mp * K * Cout,
        transcendentals=Mp if apply_ln else 0,
        bytes_accessed=Mp * K * 2 + K * Cout * 2 + Mp * Cout * 2)

    if apply_ln:
        out = pl.pallas_call(
            _proj_bias_ln_kernel,
            out_shape=jax.ShapeDtypeStruct((Mp, Cout), out_dtype),
            grid=(grid,),
            in_specs=[row_spec, w_spec, vec_spec, vec_spec, vec_spec],
            out_specs=out_spec,
            compiler_params=cparams,
            cost_estimate=cost,
        )(p_bf16, w_bf16, b2,
          gamma.reshape(1, Cout).astype(jnp.float32),
          beta.reshape(1, Cout).astype(jnp.float32))
    else:
        out = pl.pallas_call(
            _proj_bias_kernel,
            out_shape=jax.ShapeDtypeStruct((Mp, Cout), out_dtype),
            grid=(grid,),
            in_specs=[row_spec, w_spec, vec_spec],
            out_specs=out_spec,
            compiler_params=cparams,
            cost_estimate=cost,
        )(p_bf16, w_bf16, b2)
    return out[:M]


def fused_ln_patch_proj(x_tok, w, b, gamma, beta, *, in_chans, tile_m=512,
                        out_dtype=jnp.bfloat16):
    """Fused pre-LayerNorm(in_chans) + 2x2 patch projection (k2 s2 p0 token path)."""
    M, K = x_tok.shape              # K = 4 * in_chans
    Cout = w.shape[1]
    tm, Mp, grid = _pick_tile(M, tile_m)
    if Mp != M:
        x_tok = jnp.pad(x_tok, ((0, Mp - M), (0, 0)))

    kern = functools.partial(_ln_patch_proj_kernel, in_chans=in_chans)
    out = pl.pallas_call(
        kern,
        out_shape=jax.ShapeDtypeStruct((Mp, Cout), out_dtype),
        grid=(grid,),
        in_specs=[pl.BlockSpec((tm, K), lambda i: (i, 0)),
                  pl.BlockSpec((K, Cout), lambda i: (0, 0)),
                  pl.BlockSpec((1, Cout), lambda i: (0, 0)),
                  pl.BlockSpec((1, in_chans), lambda i: (0, 0)),
                  pl.BlockSpec((1, in_chans), lambda i: (0, 0))],
        out_specs=pl.BlockSpec((tm, Cout), lambda i: (i, 0)),
        compiler_params=pltpu.CompilerParams(dimension_semantics=("parallel",)),
        cost_estimate=pl.CostEstimate(
            flops=2 * Mp * K * Cout,
            transcendentals=4 * Mp,
            bytes_accessed=Mp * K * 2 + K * Cout * 2 + Mp * Cout * 2),
    )(x_tok.astype(jnp.bfloat16), w.astype(jnp.bfloat16),
      b.reshape(1, Cout).astype(jnp.float32),
      gamma.reshape(1, in_chans).astype(jnp.float32),
      beta.reshape(1, in_chans).astype(jnp.float32))
    return out[:M]


def layernorm_rows(x2d, gamma, beta, *, tile_m=512, out_dtype=jnp.bfloat16):
    """Fallback standalone pre-LN (overlapped / padded token paths)."""
    M, C = x2d.shape
    tm, Mp, grid = _pick_tile(M, tile_m)
    if Mp != M:
        x2d = jnp.pad(x2d, ((0, Mp - M), (0, 0)))
    out = pl.pallas_call(
        _ln_kernel,
        out_shape=jax.ShapeDtypeStruct((Mp, C), out_dtype),
        grid=(grid,),
        in_specs=[pl.BlockSpec((tm, C), lambda i: (i, 0)),
                  pl.BlockSpec((1, C), lambda i: (0, 0)),
                  pl.BlockSpec((1, C), lambda i: (0, 0))],
        out_specs=pl.BlockSpec((tm, C), lambda i: (i, 0)),
        compiler_params=pltpu.CompilerParams(dimension_semantics=("parallel",)),
    )(x2d, gamma.reshape(1, C).astype(jnp.float32),
      beta.reshape(1, C).astype(jnp.float32))
    return out[:M]


# ----------------------------------------------------------------------------
# Glue: im2col patch extraction (NHWC, feature order (ki, kj, c)) — wrapper-side
# layout plumbing (bf16) so the Pallas kernel sees one lane-dense wide-K matmul.
# ----------------------------------------------------------------------------
def _im2col(x_nhwc, k, stride, pad):
    if pad:
        x_nhwc = jnp.pad(x_nhwc, ((0, 0), (pad, pad), (pad, pad), (0, 0)))
    B, Hp, Wp, C = x_nhwc.shape
    Ho = (Hp - k) // stride + 1
    Wo = (Wp - k) // stride + 1
    cols = []
    for i in range(k):
        for j in range(k):
            cols.append(x_nhwc[:, i:i + (Ho - 1) * stride + 1:stride,
                                  j:j + (Wo - 1) * stride + 1:stride, :])
    patches = jnp.concatenate(cols, axis=-1)            # [B, Ho, Wo, k*k*C]
    return patches.reshape(B * Ho * Wo, k * k * C), Ho, Wo


# ----------------------------------------------------------------------------
# Parameters (PyTorch __init__ shapes / defaults) and forward pass.
# ----------------------------------------------------------------------------
def init_patch_embed(key, patch_size=4, in_chans=3, embed_dim=96, overlapped=False):
    if patch_size == 4:
        kernel, stride, pad = 7, 4, 3
        norm_dim = embed_dim                        # LayerNorm(embed_dim)
    elif patch_size == 2:
        kernel = 3 if overlapped else 2
        stride = 2
        pad = 1 if overlapped else 0
        norm_dim = in_chans                         # LayerNorm(in_chans)
    else:
        raise ValueError("PatchEmbed only defines proj/norm for patch_size in {2, 4}")

    kw_, kb_ = jax.random.split(key)
    fan_in = in_chans * kernel * kernel
    bound = float(fan_in) ** -0.5
    # PyTorch Conv2d weight [out, in, kh, kw] + bias [out]
    w_pt = jax.random.uniform(kw_, (embed_dim, in_chans, kernel, kernel),
                              jnp.float32, -bound, bound)
    b = jax.random.uniform(kb_, (embed_dim,), jnp.float32, -bound, bound)
    # kernel-side layout [kh*kw*in, out] — matches im2col feature ordering (ki, kj, c)
    w = jnp.transpose(w_pt, (2, 3, 1, 0)).reshape(kernel * kernel * in_chans, embed_dim)

    params = dict(w=w, b=b,
                  gamma=jnp.ones((norm_dim,), jnp.float32),
                  beta=jnp.zeros((norm_dim,), jnp.float32))
    cfg = dict(patch_size=patch_size, kernel=kernel, stride=stride, pad=pad)
    return params, cfg


@functools.partial(jax.jit, static_argnames=("size", "patch_size", "kernel", "stride", "pad"))
def patch_embed_forward(x, params, *, size, patch_size, kernel, stride, pad):
    H, W = size
    embed_dim = params["w"].shape[1]

    if x.ndim == 3:                                  # tokens [B, H*W, C] -> pre-LN(in_chans)
        B, HW, C = x.shape
        pre_ln, post_ln = True, False
    else:                                            # image [B, C, H, W] (NCHW like PyTorch)
        B, C, H, W = x.shape
        pre_ln, post_ln = False, True

    pad_h = (-H) % patch_size
    pad_w = (-W) % patch_size

    fuse_token_path = (pre_ln and kernel == 2 and stride == 2 and pad == 0
                       and pad_h == 0 and pad_w == 0 and C % 128 == 0)

    if fuse_token_path:
        # Pure layout transpose to token-major [M, 4*C] bf16 (no LN round trip, no im2col).
        Ho, Wo = H // 2, W // 2
        xt = x.reshape(B, Ho, 2, Wo, 2, C).transpose(0, 1, 3, 2, 4, 5)
        xt = xt.reshape(B * Ho * Wo, 4 * C).astype(jnp.bfloat16)
        y = fused_ln_patch_proj(xt, params["w"], params["b"],
                                params["gamma"], params["beta"], in_chans=C)
    else:
        if pre_ln:                                   # fallback: standalone pre-LN kernel
            xn = layernorm_rows(x.reshape(B * H * W, C).astype(jnp.bfloat16),
                                params["gamma"], params["beta"])
            x_nhwc = xn.reshape(B, H, W, C)
        else:
            x_nhwc = jnp.transpose(x, (0, 2, 3, 1)).astype(jnp.bfloat16)
        if pad_h or pad_w:                           # F.pad on right / bottom
            x_nhwc = jnp.pad(x_nhwc, ((0, 0), (0, pad_h), (0, pad_w), (0, 0)))
        patches, Ho, Wo = _im2col(x_nhwc, kernel, stride, pad)
        y = fused_patch_proj(patches, params["w"], params["b"],
                             params["gamma"], params["beta"], apply_ln=post_ln)

    return y.reshape(B, Ho * Wo, embed_dim), (Ho, Wo)


# ----------------------------------------------------------------------------
# Pure-JAX reference (f32 LN, bf16 matmul inputs, f32 accumulation) for validation.
# ----------------------------------------------------------------------------
def _ref_layernorm(x, gamma, beta):
    mu = jnp.mean(x, axis=-1, keepdims=True)
    var = jnp.mean((x - mu) ** 2, axis=-1, keepdims=True)
    return (x - mu) * lax.rsqrt(var + LN_EPS) * gamma + beta


def ref_patch_embed(x, params, *, size, patch_size, kernel, stride, pad):
    H, W = size
    if x.ndim == 3:
        B, HW, C = x.shape
        xn = _ref_layernorm(x.astype(jnp.float32), params["gamma"], params["beta"])
        x_nhwc = xn.reshape(B, H, W, C)
        post_ln = False
    else:
        B, C, H, W = x.shape
        x_nhwc = jnp.transpose(x, (0, 2, 3, 1)).astype(jnp.float32)
        post_ln = True
    pad_h = (-H) % patch_size
    pad_w = (-W) % patch_size
    if pad_h or pad_w:
        x_nhwc = jnp.pad(x_nhwc, ((0, 0), (0, pad_h), (0, pad_w), (0, 0)))
    patches, Ho, Wo = _im2col(x_nhwc, kernel, stride, pad)
    y = jnp.dot(patches.astype(jnp.bfloat16), params["w"].astype(jnp.bfloat16),
                preferred_element_type=jnp.float32) + params["b"]
    if post_ln:
        y = _ref_layernorm(y, params["gamma"], params["beta"])
    return y.reshape(B, Ho * Wo, -1), (Ho, Wo)


if __name__ == "__main__":
    root = jax.random.PRNGKey(0)
    k_img, k_tok, k_p4, k_p2 = jax.random.split(root, 4)

    # --- Path A: 4-D image input, patch_size=4 stem (conv 7x7 s4 p3, post-LN over embed_dim)
    B, Cin, H, W = 2, 3, 32, 32
    embed_dim = 128                                  # multiple of 128 -> lane-dense tiles
    x_img = jax.random.normal(k_img, (B, Cin, H, W), jnp.float32)
    params4, cfg4 = init_patch_embed(k_p4, patch_size=4, in_chans=Cin, embed_dim=embed_dim)

    out4, size4 = patch_embed_forward(x_img, params4, size=(H, W), **cfg4)
    out4 = jax.block_until_ready(out4)
    ref4, rsize4 = ref_patch_embed(x_img, params4, size=(H, W), **cfg4)

    assert out4.shape == (B, (H // 4) * (W // 4), embed_dim), out4.shape
    assert (int(size4[0]), int(size4[1])) == rsize4 == (H // 4, W // 4)
    out4_f32 = out4.astype(jnp.float32)
    assert bool(jnp.all(jnp.isfinite(out4_f32)))
    assert bool(jnp.allclose(out4_f32, ref4, atol=3e-2, rtol=3e-2)), \
        float(jnp.max(jnp.abs(out4_f32 - ref4)))

    # --- Path B: 3-D token input, patch_size=2 downsample (pre-LN over in_chans, conv 2x2 s2)
    B2, Hs, Ws, C2 = 2, 16, 16, 128
    embed_dim2 = 256
    x_tok = jax.random.normal(k_tok, (B2, Hs * Ws, C2), jnp.float32)
    params2, cfg2 = init_patch_embed(k_p2, patch_size=2, in_chans=C2, embed_dim=embed_dim2)

    out2, size2 = patch_embed_forward(x_tok, params2, size=(Hs, Ws), **cfg2)
    out2 = jax.block_until_ready(out2)
    ref2, rsize2 = ref_patch_embed(x_tok, params2, size=(Hs, Ws), **cfg2)

    assert out2.shape == (B2, (Hs // 2) * (Ws // 2), embed_dim2), out2.shape
    assert (int(size2[0]), int(size2[1])) == rsize2 == (Hs // 2, Ws // 2)
    out2_f32 = out2.astype(jnp.float32)
    assert bool(jnp.all(jnp.isfinite(out2_f32)))
    assert bool(jnp.allclose(out2_f32, ref2, atol=3e-2, rtol=3e-2)), \
        float(jnp.max(jnp.abs(out2_f32 - ref2)))

    print("KERNEL_OK")
</pallas_src>

<mosaic_0001>
module attributes {stable_mosaic.version = 11 : i64} {
  func.func @_proj_bias_ln_kernel(%arg0: i32, %arg1: memref<64x147xbf16, #tpu.memory_space<vmem>>, %arg2: memref<147x128xbf16, #tpu.memory_space<vmem>>, %arg3: memref<1x128xf32, #tpu.memory_space<vmem>>, %arg4: memref<1x128xf32, #tpu.memory_space<vmem>>, %arg5: memref<1x128xf32, #tpu.memory_space<vmem>>, %arg6: memref<64x128xbf16, #tpu.memory_space<vmem>>) attributes {dimension_semantics = [#tpu.dimension_semantics<parallel>], iteration_bounds = array<i64: 2>, scalar_prefetch = 0 : i64, scratch_operands = 0 : i64, tpu.core_type = #tpu.core_type<tc>, window_params = [{transform_indices = @transform_0, window_bounds = array<i64: 64, 147>}, {pipeline_mode = #tpu.pipeline_mode<synchronous>, transform_indices = @transform_1, window_bounds = array<i64: 147, 128>}, {pipeline_mode = #tpu.pipeline_mode<synchronous>, transform_indices = @transform_2, window_bounds = array<i64: 1, 128>}, {pipeline_mode = #tpu.pipeline_mode<synchronous>, transform_indices = @transform_3, window_bounds = array<i64: 1, 128>}, {pipeline_mode = #tpu.pipeline_mode<synchronous>, transform_indices = @transform_4, window_bounds = array<i64: 1, 128>}, {transform_indices = @transform_5, window_bounds = array<i64: 64, 128>}]} {
    %c0 = arith.constant 0 : index
    %c0_0 = arith.constant 0 : index
    %0 = vector.load %arg1[%c0, %c0_0] : memref<64x147xbf16, #tpu.memory_space<vmem>>, vector<64x147xbf16>
    %c0_1 = arith.constant 0 : index
    %c0_2 = arith.constant 0 : index
    %1 = vector.load %arg2[%c0_1, %c0_2] : memref<147x128xbf16, #tpu.memory_space<vmem>>, vector<147x128xbf16>
    %cst = arith.constant dense<0.000000e+00> : vector<64x128xf32>
    %2 = tpu.matmul %0, %1, %cst {dimension_numbers = #tpu.dot_dimension_numbers<[1], [0], [0], [1], [0, 0, 1, 1], [], []>} : vector<64x147xbf16>, vector<147x128xbf16>, vector<64x128xf32> -> vector<64x128xf32>
    %c0_3 = arith.constant 0 : index
    %c0_4 = arith.constant 0 : index
    %3 = vector.load %arg3[%c0_3, %c0_4] : memref<1x128xf32, #tpu.memory_space<vmem>>, vector<1x128xf32>
    %4 = vector.broadcast %3 : vector<1x128xf32> to vector<64x128xf32>
    %5 = arith.addf %2, %4 : vector<64x128xf32>
    %cst_5 = arith.constant dense<0.000000e+00> : vector<64xf32>
    %6 = vector.multi_reduction <add>, %5, %cst_5 [1] : vector<64x128xf32> to vector<64xf32>
    %7 = vector.shape_cast %6 : vector<64xf32> to vector<64x1xf32>
    %cst_6 = arith.constant 1.280000e+02 : f32
    %8 = vector.broadcast %cst_6 : f32 to vector<64x1xf32>
    %9 = arith.divf %7, %8 : vector<64x1xf32>
    %10 = vector.broadcast %9 : vector<64x1xf32> to vector<64x128xf32>
    %11 = arith.subf %5, %10 : vector<64x128xf32>
    %12 = arith.mulf %11, %11 : vector<64x128xf32>
    %cst_7 = arith.constant dense<0.000000e+00> : vector<64xf32>
    %13 = vector.multi_reduction <add>, %12, %cst_7 [1] : vector<64x128xf32> to vector<64xf32>
    %14 = vector.shape_cast %13 : vector<64xf32> to vector<64x1xf32>
    %cst_8 = arith.constant 1.280000e+02 : f32
    %15 = vector.broadcast %cst_8 : f32 to vector<64x1xf32>
    %16 = arith.divf %14, %15 : vector<64x1xf32>
    %cst_9 = arith.constant 9.99999974E-6 : f32
    %17 = vector.broadcast %cst_9 : f32 to vector<64x1xf32>
    %18 = arith.addf %16, %17 : vector<64x1xf32>
    %19 = math.rsqrt %18 : vector<64x1xf32>
    %20 = vector.broadcast %19 : vector<64x1xf32> to vector<64x128xf32>
    %21 = arith.mulf %11, %20 : vector<64x128xf32>
    %c0_10 = arith.constant 0 : index
    %c0_11 = arith.constant 0 : index
    %22 = vector.load %arg4[%c0_10, %c0_11] : memref<1x128xf32, #tpu.memory_space<vmem>>, vector<1x128xf32>
    %23 = vector.broadcast %22 : vector<1x128xf32> to vector<64x128xf32>
    %24 = arith.mulf %21, %23 : vector<64x128xf32>
    %c0_12 = arith.constant 0 : index
    %c0_13 = arith.constant 0 : index
    %25 = vector.load %arg5[%c0_12, %c0_13] : memref<1x128xf32, #tpu.memory_space<vmem>>, vector<1x128xf32>
    %26 = vector.broadcast %25 : vector<1x128xf32> to vector<64x128xf32>
    %27 = arith.addf %24, %26 : vector<64x128xf32>
    %28 = arith.truncf %27 : vector<64x128xf32> to vector<64x128xbf16>
    %c0_14 = arith.constant 0 : index
    %c0_15 = arith.constant 0 : index
    %29 = vector.load %arg6[%c0_14, %c0_15] : memref<64x128xbf16, #tpu.memory_space<vmem>>, vector<64x128xbf16>
    tpu.vector_store %arg6[%c0_14, %c0_15], %28 {strides = array<i32>} : memref<64x128xbf16, #tpu.memory_space<vmem>>, vector<64x128xbf16>,
    return
  }
  func.func @transform_0(%arg0: i32) -> (i32, i32) {
    %c0_i32 = arith.constant 0 : i32
    %c0_i32_0 = arith.constant 0 : i32
    return %arg0, %c0_i32 : i32, i32
  }
  func.func @transform_1(%arg0: i32) -> (i32, i32) {
    %c0_i32 = arith.constant 0 : i32
    %c0_i32_0 = arith.constant 0 : i32
    %c0_i32_1 = arith.constant 0 : i32
    return %c0_i32, %c0_i32_0 : i32, i32
  }
  func.func @transform_2(%arg0: i32) -> (i32, i32) {
    %c0_i32 = arith.constant 0 : i32
    %c0_i32_0 = arith.constant 0 : i32
    %c0_i32_1 = arith.constant 0 : i32
    return %c0_i32, %c0_i32_0 : i32, i32
  }
  func.func @transform_3(%arg0: i32) -> (i32, i32) {
    %c0_i32 = arith.constant 0 : i32
    %c0_i32_0 = arith.constant 0 : i32
    %c0_i32_1 = arith.constant 0 : i32
    return %c0_i32, %c0_i32_0 : i32, i32
  }
  func.func @transform_4(%arg0: i32) -> (i32, i32) {
    %c0_i32 = arith.constant 0 : i32
    %c0_i32_0 = arith.constant 0 : i32
    %c0_i32_1 = arith.constant 0 : i32
    return %c0_i32, %c0_i32_0 : i32, i32
  }
  func.func @transform_5(%arg0: i32) -> (i32, i32) {
    %c0_i32 = arith.constant 0 : i32
    %c0_i32_0 = arith.constant 0 : i32
    return %arg0, %c0_i32 : i32, i32
  }
}

</mosaic_0001>

<bundles_post_ra>
// kernel: patch_embed_forward.1
= control target key start
LH: loop header
LB: loop body
LE: loop exit
PB: predicated region body
PF: predicated region fallthrough
CT: control target
= control target key end

     0   :  { %10 = vsyncpa [#allocation3], 0  ;;  %s1155_s0 = inlined_call_operand.vmem [shape: bf16[128,147], index: 0, kind: input, shape index: {}]   ;;  %s1156_s1 = inlined_call_operand.vmem [shape: bf16[147,128], index: 1, kind: input, shape index: {}]   ;;  %s1157_s2 = inlined_call_operand.vmem [shape: f32[1,128], index: 2, kind: input, shape index: {}]   ;;  %s1158_s3 = inlined_call_operand.vmem [shape: f32[1,128], index: 3, kind: input, shape index: {}]   ;;  %s1159_s4 = inlined_call_operand.vmem [shape: f32[1,128], index: 4, kind: input, shape index: {}]   ;;  %s1160_s5 = inlined_call_operand.hbm [shape: bf16[128,128], index: 5, kind: output, shape index: {}]  }
   0x1   :  { %12 = vsyncpa [#allocation3 + $0x1], 0  ;;  %s956_s18 = smov 0   ;;  %s958_s19 = smov 0  }
   0x2   :  { %s960_s20 = smov 0   ;;  %s962_s21 = smov 0  }
   0x3 LB: > { %s977_s22 = sadd.s32 4294967295, %s919_s21   ;;  %s677_s23 = sadd.s32 4294967294, %s919_s21   ;;  %s919_s21 = sphi %s962_s21, %s1166_s21   ;;  %s915_s20 = sphi %s960_s20, %s1165_s20   ;;  %s911_s19 = sphi %s958_s19, %s1164_s19   ;;  %s907_s18 = sphi %s956_s18, %s1163_s18  }
   0x4   : > { %s981_s24 = sadd.s32 1, %s919_s21   ;;  %s135_s25 = sadd.s32 1, %s915_s20 }
   0x5   : > { %s132_s26 = ssub.s32 %s919_s21, %s981_s24  ;;  %p145_p0 = scmp.ne.s32.totalorder %s915_s20, %s911_s19 }
   0x6   : > { %p133_p1 = scmp.eq.s32.totalorder %s132_s26, 0  ;;  %p146_p2 = scmp.eq.s32.totalorder %s977_s22, 1 }
   0x7   : > { %p151_p3 = scmp.ne.s32.totalorder %s911_s19, %s907_s18  ;;  %p152_p4 = scmp.eq.s32.totalorder %s677_s23, 1 }
   0x8   : > { %s992_s27 = scalar_select %p133_p1, %s915_s20, %s135_s25  }
   0x9   : > { %p994_p5 = por %p146_p2, %p145_p0  ;;  %p998_p6 = por %p152_p4, %p151_p3 }
   0xa   : > { %p680_p7 = scmp.ge.s32.totalorder %s919_s21, 1  ;;  %p192_p8 = scmp.lt.s32.totalorder %s919_s21, 3 }
   0xc   : > { %p193_p9 = pnand %p680_p7, %p192_p8 }
   0xd   : > { %v819_v0 = vld [vmem:[%s1156_s1] sm:$0xff] (!%p193_p9)   ;;  %v921_v1 = vmov (!%p193_p9), 0   ;;  %v820_v2 = vld [vmem:[%s1156_s1 + $0x8] sm:$0xff] (!%p193_p9)   ;;  %v821_v3 = vld [vmem:[%s1156_s1 + $0x10] sm:$0xff] (!%p193_p9)   ;;  %s682_s11 = sshll.u32 (!%p193_p9), %s977_s22, 3  ;;  %vm357_vm0 = vcmask (!%p193_p9), 154624  }
   0xe   : > { %196 = sbr.rel (%p193_p9) target bundleno = 616 (0x268), region = 40  ;;  %377 = vmatprep.subr.bf16.mxu0 (!%p193_p9), %v921_v1  ;;  %756 = vmatprep.subr.bf16.mxu1 (!%p193_p9), %v921_v1  ;;  %p222_p10 = scmp.lt.s32.totalorder (!%p193_p9), %s682_s11, 15  ;;  %v822_v4 = vld [vmem:[%s1156_s1 + $0x18] sm:$0xff] (!%p193_p9)   ;;  %v823_v5 = vld [vmem:[%s1156_s1 + $0x20] sm:$0xff] (!%p193_p9)   ;;  %v824_v8 = vld [vmem:[%s1156_s1 + $0x28] sm:$0xff] (!%p193_p9)   ;;  %vm370_vm1 = vcmask (!%p193_p9), 1040384  }
   0xf   : > { %378 = vmatpush1.bf16.msra.mxu0 (!%p193_p9), %v819_v0  ;;  %766 = vmatpush1.bf16.msra.mxu1 (!%p193_p9), %v819_v0  ;;  %v825_v9 = vld [vmem:[%s1156_s1 + $0x30] sm:$0xff] (!%p193_p9)   ;;  %v826_v10 = vld [vmem:[%s1156_s1 + $0x38] sm:$0xff] (!%p193_p9)   ;;  %vm371_vm2 = vcmask (!%p193_p9), 1041408   ;;  %v922_v11 = vmov (!%p193_p9), 65535   ;;  %v827_v13 = vld [vmem:[%s1156_s1 + $0x40] sm:$0xff] (!%p193_p9)   ;;  %s218_s23 = sand.u32 (!%p193_p9), 1, %s911_s19  }
  0x10   : > { %379 = vmatprep.subr.bf16.mxu0 (!%p193_p9), %v921_v1  ;;  %757 = vmatprep.subr.bf16.mxu1 (!%p193_p9), %v921_v1  ;;  %v372_v12 = vsel (!%p193_p9), %vm370_vm1, 4294967295, %v922_v11  ;;  %v828_v14 = vld [vmem:[%s1156_s1 + $0x48] ss:$0 sps:$4 sm:$0x33] (!%p193_p9)   ;;  %v685_v23 = vld [vmem:[%s1157_s2] ss:$0 sm:$0xff] (!%p193_p9) }
  0x11   : > { %v373_v15 = vsel (!%p193_p9), %vm371_vm2, %v372_v12, 0  ;;  %s681_s30 = sshll.u32 (!%p193_p9), %s218_s23, 5  ;;  %s732_s7 = sshll.u32 (!%p193_p9), %s977_s22, 9 }
  0x12   : > { %v375_v16 = vand.u32 (!%p193_p9), %v828_v14, %v373_v15  ;;  %s220_s6 = scalar_lea.vmem (!%p193_p9), [#allocation2], %s681_s30  ;;  %s1114_s12 = scalar_lea.sflag (!%p193_p9), [#allocation3], %s218_s23 }
  0x13   : > { %380 = vmatpush1.bf16.msra.mxu0 (!%p193_p9), %v820_v2  ;;  %767 = vmatpush1.bf16.msra.mxu1 (!%p193_p9), %v820_v2  ;;  %s615_s8 = sshll.u32 (!%p193_p9), %s220_s6, 4  ;;  %s923_s13 = smov (!%p193_p9), [#allocation2]   ;;  %s1110_s8 = int_to_ptr.vmem [resolvable:$true] %s615_s8 }
  0x14   : > { %381 = vmatprep.subr.bf16.mxu0 (!%p193_p9), %v921_v1  ;;  %758 = vmatprep.subr.bf16.mxu1 (!%p193_p9), %v921_v1  ;;  %s857_s22 = scalar_lea.vmem (!%p193_p9), %s1110_s8, 512 }
  0x15   : > { %s1168_s11 = smov (!%p222_p10, %s682_s11), 15  ;;  %p858_p11 = scmp.ne.s32.totalorder %s1110_s8, %s857_s22 }
  0x16   : > { %s723_s14 = sshll.u32 %s1168_s11, 3  ;;  %s1108_s11 = scalar_lea.hbm %s1160_s5, %s732_s7 }
  0x17   : > { %382 = vmatpush1.bf16.msra.mxu0 %v821_v3  ;;  %768 = vmatpush1.bf16.msra.mxu1 %v821_v3  ;;  %s1020_s17 = scalar_lea.vmem %s1155_s0, %s723_s14  ;;  %p859_p12 = pnand %p858_p11, %p994_p5 }
  0x18   : > { %383 = vmatprep.subr.bf16.mxu0 %v921_v1  ;;  %759 = vmatprep.subr.bf16.mxu1 %v921_v1  ;;  %v831_v6 = vld [vmem:[%s1020_s17 + $0x4] ss:$8 sps:$4 sm:$0xff]   ;;  %v829_v17 = vld [vmem:[%s1020_s17] ss:$8 sps:$4 sm:$0xff]   ;;  %v835_v19 = vld [vmem:[%s1020_s17 + $0x14] ss:$8 sps:$4 sm:$0xff]  }
  0x19   : > { %v834_v7 = vld [vmem:[%s1020_s17 + $0x24] ss:$8 sps:$4 sm:$0xff]   ;;  %704 = vmatprep.mubr.msk.bf16.mxu0 %vm357_vm0, %v831_v6  ;;  %v832_v18 = vld [vmem:[%s1020_s17 + $0x20] ss:$8 sps:$4 sm:$0xff]   ;;  %v838_v20 = vld [vmem:[%s1020_s17 + $0x34] ss:$8 sps:$4 sm:$0xff]   ;;  %p860_p13 = pneg %p859_p12 }
  0x1a   : > { %706 = vmatprep.mubr.msk.bf16.mxu1 %vm357_vm0, %v834_v7  ;;  %v837_v21 = vld [vmem:[%s1020_s17 + $0x10] ss:$8 sps:$4 sm:$0xff]   ;;  %s861_s14 = sshll.u32 %s923_s13, 4  ;;  %s862_s14 = int_to_ptr.vmem [resolvable:$false] %s861_s14 }
  0x1b   : > { %384 = vmatpush1.bf16.msra.mxu0 %v822_v4  ;;  %769 = vmatpush1.bf16.msra.mxu1 %v822_v4  ;;  %v840_v22 = vld [vmem:[%s1020_s17 + $0x30] ss:$8 sps:$4 sm:$0xff]   ;;  %s863_s15 = scalar_lea.vmem %s862_s14, 1024  ;;  %p864_p0 = scmp.lt.s32.totalorder %s1110_s8, %s862_s14 }
  0x1c   : > { %385 = vmatprep.subr.bf16.mxu0 %v921_v1  ;;  %760 = vmatprep.subr.bf16.mxu1 %v921_v1  ;;  %p865_p1 = scmp.lt.s32.totalorder %s863_s15, %s857_s22 }
  0x1e   : > { %p866_p2 = por %p865_p1, %p864_p0 }
  0x1f   : > { %386 = vmatpush1.bf16.msra.mxu0 %v823_v5  ;;  %770 = vmatpush1.bf16.msra.mxu1 %v823_v5 }
  0x20   : > { %387 = vmatprep.subr.bf16.mxu0 %v921_v1  ;;  %761 = vmatprep.subr.bf16.mxu1 %v921_v1  ;;  %p867_p3 = pnand %p866_p2, %p860_p13 }
  0x23   : > { %388 = vmatpush1.bf16.msra.mxu0 %v824_v8  ;;  %771 = vmatpush1.bf16.msra.mxu1 %v824_v8 }
  0x24   : > { %389 = vmatprep.subr.bf16.mxu0 %v921_v1  ;;  %762 = vmatprep.subr.bf16.mxu1 %v921_v1 }
  0x27   : > { %390 = vmatpush1.bf16.msra.mxu0 %v825_v9  ;;  %772 = vmatpush1.bf16.msra.mxu1 %v825_v9 }
  0x28   : > { %391 = vmatprep.subr.bf16.mxu0 %v921_v1  ;;  %763 = vmatprep.subr.bf16.mxu1 %v921_v1 }
  0x2b   : > { %392 = vmatpush1.bf16.msra.mxu0 %v826_v10  ;;  %773 = vmatpush1.bf16.msra.mxu1 %v826_v10 }
  0x2c   : > { %393 = vmatprep.subr.bf16.mxu0 %v921_v1  ;;  %764 = vmatprep.subr.bf16.mxu1 %v921_v1 }
  0x2f   : > { %394 = vmatpush1.bf16.msra.mxu0 %v827_v13  ;;  %774 = vmatpush1.bf16.msra.mxu1 %v827_v13 }
  0x30   : > { %395 = vmatprep.subr.bf16.mxu0 %v921_v1  ;;  %765 = vmatprep.subr.bf16.mxu1 %v921_v1 }
  0x33   : > { %396 = vmatpush1.bf16.msra.mxu0 %v375_v16  ;;  %775 = vmatpush1.bf16.msra.mxu1 %v375_v16 }
  0x36   : > { %410 = vmatmul.mubr.bf16.vlgmr.msra.gmra.mrb[0].mxu0 %v829_v17  ;;  %426 = vmatmul.mubr.bf16.vlgmr.msra.gmra.mrb[0].mxu1 %v832_v18 }
  0x37   : > { %705 = vmatprep.mubr.msk.bf16.mxu0 %vm357_vm0, %v835_v19  ;;  %707 = vmatprep.mubr.msk.bf16.mxu1 %vm357_vm0, %v838_v20 }
  0x3e   : > { %418 = vmatmul.mubr.bf16.gmra.mrb[4].mxu0 %v837_v21  ;;  %434 = vmatmul.mubr.bf16.gmra.mrb[4].mxu1 %v840_v22 }
 0x109   : > { %v411_v24 = vpop.f32.mrb[0].mxu0  ;;  %v427_v25 = vpop.f32.mrb[0].mxu1 }
 0x10a   : > { %v412_v26 = vadd.f32 %v685_v23, %v411_v24  ;;  %v413_v27 = vpop.f32.mrb[1].mxu0  ;;  %v429_v28 = vpop.f32.mrb[1].mxu1  ;;  %v428_v31 = vadd.f32 %v685_v23, %v427_v25 }
 0x10b   : > { %v414_v29 = vpop.f32.mrb[2].mxu0  ;;  %v430_v30 = vpop.f32.mrb[2].mxu1 }
 0x10c   : > { %v431_v32 = vadd.f32 %v685_v23, %v430_v30  ;;  %v416_v33 = vpop.f32.mrb[3].mxu0  ;;  %442 = vadd.xlane.f32.xlu0 %v412_v26  ;;  %v432_v34 = vpop.f32.mrb[3].mxu1  ;;  %v415_v37 = vadd.f32 %v685_v23, %v414_v29 }
 0x10e   : > { %452 = vadd.xlane.f32.xlu1 %v431_v32 }
 0x110   : > { %450 = vadd.xlane.f32.xlu0 %v428_v31 }
 0x111   : > { %v419_v35 = vpop.f32.mrb[4].mxu0  ;;  %v435_v36 = vpop.f32.mrb[4].mxu1 }
 0x112   : > { %v420_v38 = vadd.f32 %v685_v23, %v419_v35  ;;  %v421_v39 = vpop.f32.mrb[5].mxu0  ;;  %v437_v40 = vpop.f32.mrb[5].mxu1  ;;  %v436_v45 = vadd.f32 %v685_v23, %v435_v36 }
 0x113   : > { %v422_v41 = vpop.f32.mrb[6].mxu0  ;;  %v438_v42 = vpop.f32.mrb[6].mxu1 }
 0x114   : > { %v423_v43 = vadd.f32 %v685_v23, %v422_v41  ;;  %446 = vadd.xlane.f32.xlu1 %v420_v38  ;;  %444 = vadd.xlane.f32.xlu0 %v415_v37  ;;  %v424_v44 = vpop.f32.mrb[7].mxu0  ;;  %v440_v46 = vpop.f32.mrb[7].mxu1  ;;  %v439_v47 = vadd.f32 %v685_v23, %v438_v42  ;;  %v708_v41 = vld [vmem:[%s1158_s3] ss:$0 sm:$0xff] }
 0x118   : > { %448 = vadd.xlane.f32.xlu1 %v423_v43  ;;  %454 = vadd.xlane.f32.xlu0 %v436_v45 }
 0x11c   : > { %456 = vadd.xlane.f32.xlu1 %v439_v47 }
 0x199   : > { %v443_v48 = vpop.xlane.xlu0 %442 }
 0x19a   : > { %v459_v49 = vmul.f32 0.0078125, %v443_v48 }
 0x19b   : > { %v453_v51 = vpop.xlane.xlu1 %452 }
 0x19c   : > { %v1055_v50 = vsub.f32 %v412_v26, %v459_v49  ;;  %v464_v56 = vmul.f32 0.0078125, %v453_v51  ;;  %v709_v49 = vld [vmem:[%s1159_s4] ss:$0 sm:$0xff] }
 0x19d   : > { %v451_v52 = vpop.xlane.xlu0 %450 }
 0x19e   : > { %v463_v53 = vmul.f32 0.0078125, %v451_v52  ;;  %v475_v54 = vmul.f32 %v1055_v50, %v1055_v50  ;;  %v1067_v0 = vsub.f32 %v431_v32, %v464_v56 }
 0x1a0   : > { %v1059_v55 = vsub.f32 %v428_v31, %v463_v53  ;;  %483 = vadd.xlane.f32.xlu0 %v475_v54  ;;  %v480_v11 = vmul.f32 %v1067_v0, %v1067_v0 }
 0x1a1   : > { %v447_v57 = vpop.xlane.xlu1 %446  ;;  %v445_v58 = vpop.xlane.xlu0 %444 }
 0x1a2   : > { %v461_v59 = vmul.f32 0.0078125, %v447_v57  ;;  %v460_v60 = vmul.f32 0.0078125, %v445_v58  ;;  %v479_v61 = vmul.f32 %v1059_v55, %v1059_v55 }
 0x1a4   : > { %v1063_v62 = vsub.f32 %v420_v38, %v461_v59  ;;  %v1065_v63 = vsub.f32 %v415_v37, %v460_v60  ;;  %491 = vadd.xlane.f32.xlu0 %v479_v61 }
 0x1a5   : > { %v449_v1 = vpop.xlane.xlu1 %448  ;;  %v455_v2 = vpop.xlane.xlu0 %454 }
 0x1a6   : > { %v462_v3 = vmul.f32 0.0078125, %v449_v1  ;;  %v465_v4 = vmul.f32 0.0078125, %v455_v2  ;;  %v477_v5 = vmul.f32 %v1063_v62, %v1063_v62  ;;  %v476_v6 = vmul.f32 %v1065_v63, %v1065_v63 }
 0x1a8   : > { %v1073_v7 = vsub.f32 %v436_v45, %v465_v4  ;;  %487 = vadd.xlane.f32.xlu0 %v477_v5  ;;  %485 = vadd.xlane.f32.xlu1 %v476_v6  ;;  %v1075_v9 = vsub.f32 %v423_v43, %v462_v3 }
 0x1a9   : > { %v457_v8 = vpop.xlane.xlu1 %456 }
 0x1aa   : > { %v466_v10 = vmul.f32 0.0078125, %v457_v8  ;;  %v481_v12 = vmul.f32 %v1073_v7, %v1073_v7  ;;  %v478_v14 = vmul.f32 %v1075_v9, %v1075_v9 }
 0x1ac   : > { %493 = vadd.xlane.f32.xlu1 %v480_v11  ;;  %495 = vadd.xlane.f32.xlu0 %v481_v12  ;;  %v1081_v13 = vsub.f32 %v439_v47, %v466_v10 }
 0x1ae   : > { %v482_v15 = vmul.f32 %v1081_v13, %v1081_v13 }
 0x1b0   : > { %489 = vadd.xlane.f32.xlu1 %v478_v14 }
 0x1b4   : > { %497 = vadd.xlane.f32.xlu1 %v482_v15 }
 0x22d   : > { %v484_v16 = vpop.xlane.xlu0 %483 }
 0x22e   : > { %v499_v17 = vmul.f32 0.0078125, %v484_v16 }
 0x230   : > { %v507_v18 = vadd.f32 1e-05, %v499_v17 }
 0x231   : > { %v492_v19 = vpop.xlane.xlu0 %491 }
 0x232   : > { %v503_v20 = vmul.f32 0.0078125, %v492_v19  ;;  %841 = vrsqrt.f32 %v507_v18 }
 0x234   : > { %v511_v21 = vadd.f32 1e-05, %v503_v20 }
 0x235   : > { %v486_v22 = vpop.xlane.xlu1 %485  ;;  %v488_v23 = vpop.xlane.xlu0 %487 }
 0x236   : > { %v500_v24 = vmul.f32 0.0078125, %v486_v22  ;;  %v501_v25 = vmul.f32 0.0078125, %v488_v23  ;;  %843 = vrsqrt.f32 %v511_v21 }
 0x238   : > { %v508_v26 = vadd.f32 1e-05, %v500_v24  ;;  %v509_v27 = vadd.f32 1e-05, %v501_v25 }
 0x239   : > { %v494_v28 = vpop.xlane.xlu1 %493  ;;  %v496_v29 = vpop.xlane.xlu0 %495 }
 0x23a   : > { %845 = vrsqrt.f32 %v508_v26  ;;  %v504_v30 = vmul.f32 0.0078125, %v494_v28  ;;  %v505_v31 = vmul.f32 0.0078125, %v496_v29 }
 0x23b   : > { %847 = vrsqrt.f32 %v509_v27 }
 0x23c   : > { %v512_v32 = vadd.f32 1e-05, %v504_v30  ;;  %v513_v33 = vadd.f32 1e-05, %v505_v31  ;;  %v842_v35 = vpop.eup %841 }
 0x23d   : > { %v490_v34 = vpop.xlane.xlu1 %489  ;;  %v523_v39 = vmul.f32 %v842_v35, %v1055_v50 }
 0x23e   : > { %849 = vrsqrt.f32 %v512_v32  ;;  %v502_v36 = vmul.f32 0.0078125, %v490_v34 }
 0x23f   : > { %851 = vrsqrt.f32 %v513_v33  ;;  %v538_v46 = vmul.f32 %v708_v41, %v523_v39 }
 0x240   : > { %v510_v37 = vadd.f32 1e-05, %v502_v36  ;;  %v844_v38 = vpop.eup %843 }
 0x241   : > { %v498_v40 = vpop.xlane.xlu1 %497  ;;  %v527_v44 = vmul.f32 %v844_v38, %v1059_v55  ;;  %v553_v53 = vadd.f32 %v709_v49, %v538_v46 }
 0x242   : > { %853 = vrsqrt.f32 %v510_v37  ;;  %v506_v42 = vmul.f32 0.0078125, %v498_v40 }
 0x243   : > { %v542_v52 = vmul.f32 %v708_v41, %v527_v44 }
 0x244   : > { %v846_v43 = vpop.eup %845  ;;  %v514_v45 = vadd.f32 1e-05, %v506_v42 }
 0x245   : > { %v524_v47 = vmul.f32 %v846_v43, %v1065_v63  ;;  %v848_v48 = vpop.eup %847  ;;  %v557_v61 = vadd.f32 %v709_v49, %v542_v52 }
 0x246   : > { %855 = vrsqrt.f32 %v514_v45  ;;  %v525_v55 = vmul.f32 %v848_v48, %v1063_v62 }
 0x247   : > { %v539_v50 = vmul.f32 %v708_v41, %v524_v47 }
 0x248   : > { %v850_v51 = vpop.eup %849  ;;  %v540_v63 = vmul.f32 %v708_v41, %v525_v55 }
 0x249   : > { %v554_v54 = vadd.f32 %v709_v49, %v539_v50  ;;  %v528_v56 = vmul.f32 %v850_v51, %v1067_v0  ;;  %v852_v57 = vpop.eup %851 }
 0x24a   : > { %v529_v2 = vmul.f32 %v852_v57, %v1073_v7  ;;  %v555_v62 = vadd.f32 %v709_v49, %v540_v63 }
 0x24b   : > { %v736_v58 = vpack.c.bf16 %v554_v54, %v553_v53  ;;  %v543_v59 = vmul.f32 %v708_v41, %v528_v56 }
 0x24c   : > { %v854_v60 = vpop.eup %853  ;;  %v544_v0 = vmul.f32 %v708_v41, %v529_v2 }
 0x24d   : > { %v558_v1 = vadd.f32 %v709_v49, %v543_v59  ;;  %v526_v3 = vmul.f32 %v854_v60, %v1075_v9  ;;  %737 = vst [vmem:[%s220_s6] sm:$0xff] %v736_v58  }
 0x24e   : > { %v559_v7 = vadd.f32 %v709_v49, %v544_v0 }
 0x24f   : > { %v746_v4 = vpack.c.bf16 %v558_v1, %v557_v61  ;;  %v541_v5 = vmul.f32 %v708_v41, %v526_v3 }
 0x250   : > { %v856_v6 = vpop.eup %855 }
 0x251   : > { %v556_v8 = vadd.f32 %v709_v49, %v541_v5  ;;  %v530_v10 = vmul.f32 %v856_v6, %v1081_v13  ;;  %754 = vst [vmem:[%s220_s6 + $0x10] sm:$0xff] %v746_v4  }
 0x253   : > { %v741_v11 = vpack.c.bf16 %v556_v8, %v555_v62  ;;  %v545_v12 = vmul.f32 %v708_v41, %v530_v10 }
 0x255   : > { %v560_v14 = vadd.f32 %v709_v49, %v545_v12  ;;  %753 = vst [vmem:[%s220_s6 + $0x8] sm:$0xff] %v741_v11  }
 0x257   : > { %v751_v9 = vpack.c.bf16 %v560_v14, %v559_v7 }
 0x259   : > { %755 = vst [vmem:[%s220_s6 + $0x18] sm:$0xff] %v751_v9  }
 0x25a   : > { %870 = shalt.err (!%p867_p3)
}
 0x25b   : > { %s871_s16 = scalar_lea.hbm %s1108_s11, 512  ;;  %s875_s25 = scalar_lea.hbm %s1160_s5, 1024 }
 0x25c   : > { %p872_p4 = scmp.ne.s32.totalorder %s1108_s11, %s871_s16  ;;  %p876_p9 = scmp.lt.u32.totalorder %s1108_s11, %s1160_s5 }
 0x25d   : > { %p877_p10 = scmp.lt.u32.totalorder %s875_s25, %s871_s16  ;;  %p879_p12 = scmp.lt.u32.totalorder %s871_s16, %s1108_s11 }
 0x25e   : > { %p873_p7 = pnand %p872_p4, %p994_p5 }
 0x25f   : > { %p878_p11 = por %p877_p10, %p876_p9 }
 0x260   : > { %p874_p8 = pneg %p873_p7 }
 0x261   : > { %p880_p13 = por %p879_p12, %p878_p11 }
 0x263   : > { %p881_p0 = pnand %p880_p13, %p874_p8 }
 0x265   : > { %884 = shalt.err (!%p881_p0)
}
 0x266   : > { %s924_s6 = smov 64   ;;  %s925_s7 = smov 4  }
 0x267   : > { %776 = dma.vmem_to_hbm [thread:$0]  (%p994_p5), %s1110_s8, 512, %s1108_s11, %s1114_s12, %s924_s6, %s924_s6, %s925_s7  }
 0x268 PF: > { %p782_p1 = scmp.ge.s32.totalorder %s919_s21, 2  ;;  %s630_s9 = sand.u32 1, %s907_s18  }
 0x269   : > { %s631_s10 = scalar_lea.sflag [#allocation3], %s630_s9 }
 0x26a   : > { %p779_p2 = pnand %p782_p1, %p998_p6 }
 0x26c   : > { %902 = dma.done.wait (!%p779_p2), %s631_s10, 512  }
 0x26d   : > { %904 = vsyncadd (!%p779_p2), %s631_s10, 4294966784  ;;  %p15_p3 = scmp.ge.s32.totalorder %s981_s24, 4   ;;  %s1163_s18 = smov %s911_s19 }
 0x26e   : > { %s1164_s19 = smov %s915_s20  ;;  %s1165_s20 = smov %s992_s27 }
 0x26f   : > { %s1166_s21 = smov %s981_s24  ;;  %17 = sbr.rel (!%p15_p3) target bundleno = 3 (0x3), region = 75 }
 0x276   :  { %636 = vsyncpa [#allocation3], 1 }
 0x277   :  { %638 = vsyncpa [#allocation3 + $0x1], 1 }

</bundles_post_ra>
